<compile_context>
chip_gen: v7x
topology: tpu7x:2x2x1
jax: 0.10.0
libtpu: 0.0.40
codegen_flags: <defaults>
</compile_context>

<pallas_src>
import jax
import jax.numpy as jnp
from jax.experimental import pallas as pl
from jax.experimental.pallas import tpu as pltpu

_LANE = 128
_MAX_COLS = 8192                  # one row stays a moderate, lane-dense width
_SUBLANE = 8                      # BlockSpec only needs %8 on 2nd-to-last dim
_MIN_PALLAS_BYTES = 1 << 20       # below this, XLA's memcpy is already optimal


def _copy_kernel(x_ref, o_ref):
    # Pass-through of the current (block_rows, cols) tile.
    o_ref[...] = x_ref[...]


def _block_bytes_budget() -> int:
    """Per-generation per-block byte budget (2 operands x 2 buffers in VMEM)."""
    try:
        kind = jax.devices()[0].device_kind.lower()
    except Exception:  # pragma: no cover - defensive
        kind = ""
    if "v5" in kind:            # v5e / v5 lite: 16 MiB scoped-VMEM default
        return 3 * 1024 * 1024  # 4 * 3 MiB = 12 MiB -> headroom for scratch
    if "v6" in kind or "v7" in kind:
        return 8 * 1024 * 1024  # 4 * 8 MiB = 32 MiB (explicit vmem limit set)
    return 4 * 1024 * 1024      # safe default for unknown generations


def _plan_copy(total_elems: int, itemsize: int, budget_bytes: int):
    """Pick (rows, cols, block_rows) for a lane-dense streamed copy.

    Requires total_elems % 128 == 0.  block_rows is sublane-aligned (or the
    full row extent when rows < 8) and never the whole slab for large inputs.
    """
    # Largest multiple of 128 that divides total and is <= _MAX_COLS.
    cols = None
    c = min(_MAX_COLS, (total_elems // _LANE) * _LANE)
    while c >= _LANE:
        if total_elems % c == 0:
            cols = c
            break
        c -= _LANE
    if cols is None:
        return None
    rows = total_elems // cols

    if rows < _SUBLANE:
        # Tiny slab: full-extent block on the sublane dim (allowed by the
        # (8,128) rule when it equals the full array dim).
        return rows, cols, rows

    row_bytes = cols * itemsize
    block_rows = max(_SUBLANE, (budget_bytes // row_bytes) // _SUBLANE * _SUBLANE)
    block_rows = min(block_rows, (rows // _SUBLANE) * _SUBLANE)

    # v7x megacore: make sure the parallel grid axis has >= 2 steps so both
    # TensorCores get work (no effect on single-TC v5e/v6e).
    if rows >= 2 * _SUBLANE:
        half = ((rows + 1) // 2 + _SUBLANE - 1) // _SUBLANE * _SUBLANE
        block_rows = min(block_rows, half)
    block_rows = max(block_rows, _SUBLANE)
    return rows, cols, block_rows


def resampling(x: jax.Array) -> jax.Array:
    """Resampling.forward(x) == x.

    Pure identity: no kernel launch, zero HBM traffic (fastest possible)."""
    return x


def resampling_copy(x: jax.Array, *, force_pallas: bool = False) -> jax.Array:
    """Identity that materializes a fresh output buffer.

    Uses a streamed, lane-dense Pallas copy for large tensors; small or
    awkwardly-sized tensors fall back to XLA's memcpy (already at roofline).
    """
    total = int(x.size)
    itemsize = jnp.dtype(x.dtype).itemsize
    nbytes = total * itemsize

    if total == 0:
        return jnp.copy(x)
    if not force_pallas and nbytes < _MIN_PALLAS_BYTES:
        # Tiny HRNet feature maps: fixed pallas_call overhead dominates.
        return jnp.copy(x)
    if total % _LANE != 0:
        # Cannot form a lane-dense view without an extra padding copy;
        # XLA's memcpy is already at HBM roofline for this case.
        return jnp.copy(x)

    budget = _block_bytes_budget()
    plan = _plan_copy(total, itemsize, budget)
    if plan is None:
        return jnp.copy(x)
    rows, cols, block_rows = plan
    flat = x.reshape(rows, cols)

    grid = pl.cdiv(rows, block_rows)
    block_bytes = block_rows * cols * itemsize
    # in + out, double-buffered, plus headroom for Mosaic internal scratch.
    vmem_limit = min(4 * block_bytes + (4 << 20), 48 << 20)

    out = pl.pallas_call(
        _copy_kernel,
        out_shape=jax.ShapeDtypeStruct((rows, cols), x.dtype),
        grid=(grid,),
        in_specs=[pl.BlockSpec((block_rows, cols), lambda i: (i, 0))],
        out_specs=pl.BlockSpec((block_rows, cols), lambda i: (i, 0)),
        compiler_params=pltpu.CompilerParams(
            dimension_semantics=("parallel",),   # megacore sharding on v7x
            vmem_limit_bytes=vmem_limit,
        ),
        cost_estimate=pl.CostEstimate(
            flops=0, transcendentals=0, bytes_accessed=2 * nbytes),
    )(flat)
    return out.reshape(x.shape)


if __name__ == "__main__":
    key = jax.random.PRNGKey(0)

    # Primary spec shape: NCHW feature map (batch=2, channels=4, 16x16).
    x = jax.random.normal(key, (2, 4, 16, 16), dtype=jnp.float32)

    # Forward path: true identity (no kernel launch).
    y = resampling(x)
    jax.block_until_ready(y)
    assert y.shape == x.shape and y.dtype == x.dtype
    assert bool(jnp.all(y == x))

    # Materialized-copy path at the spec shape (force the Pallas kernel).
    y2 = resampling_copy(x, force_pallas=True)
    jax.block_until_ready(y2)
    assert y2.shape == x.shape and y2.dtype == x.dtype
    assert bool(jnp.all(y2 == x))

    # A slightly larger (still small) input to exercise the multi-step,
    # sublane-aligned streaming grid path.
    x3 = jax.random.normal(key, (4, 32, 32, 32), dtype=jnp.float32)
    y3 = resampling_copy(x3, force_pallas=True)
    jax.block_until_ready(y3)
    assert y3.shape == x3.shape and y3.dtype == x3.dtype
    assert bool(jnp.all(y3 == x3))

    print("KERNEL_OK")
</pallas_src>

<mosaic_0001>
module attributes {stable_mosaic.version = 11 : i64} {
  func.func @_copy_kernel(%arg0: i32, %arg1: memref<1x2048xf32, #tpu.memory_space<vmem>>, %arg2: memref<1x2048xf32, #tpu.memory_space<vmem>>) attributes {dimension_semantics = [#tpu.dimension_semantics<parallel>], iteration_bounds = array<i64: 1>, scalar_prefetch = 0 : i64, scratch_operands = 0 : i64, tpu.core_type = #tpu.core_type<tc>, window_params = [{transform_indices = @transform_0, window_bounds = array<i64: 1, 2048>}, {transform_indices = @transform_1, window_bounds = array<i64: 1, 2048>}]} {
    %c0 = arith.constant 0 : index
    %c0_0 = arith.constant 0 : index
    %0 = vector.load %arg1[%c0, %c0_0] : memref<1x2048xf32, #tpu.memory_space<vmem>>, vector<1x2048xf32>
    %c0_1 = arith.constant 0 : index
    %c0_2 = arith.constant 0 : index
    %1 = vector.load %arg2[%c0_1, %c0_2] : memref<1x2048xf32, #tpu.memory_space<vmem>>, vector<1x2048xf32>
    tpu.vector_store %arg2[%c0_1, %c0_2], %0 {strides = array<i32>} : memref<1x2048xf32, #tpu.memory_space<vmem>>, vector<1x2048xf32>,
    return
  }
  func.func @transform_0(%arg0: i32) -> (i32, i32) {
    %c0_i32 = arith.constant 0 : i32
    %c0_i32_0 = arith.constant 0 : i32
    return %arg0, %c0_i32 : i32, i32
  }
  func.func @transform_1(%arg0: i32) -> (i32, i32) {
    %c0_i32 = arith.constant 0 : i32
    %c0_i32_0 = arith.constant 0 : i32
    return %arg0, %c0_i32 : i32, i32
  }
}

</mosaic_0001>

<bundles_post_ra>
// kernel: tpu_custom_call.1
= control target key start
LH: loop header
LB: loop body
LE: loop exit
PB: predicated region body
PF: predicated region fallthrough
CT: control target
= control target key end

     0   :  { %6 = vsyncpa [#allocation3], 0  ;;  %s126_s0 = inlined_call_operand.hbm [shape: f32[1,2048], index: 0, kind: input, shape index: {}]   ;;  %s127_s1 = inlined_call_operand.hbm [shape: f32[1,2048], index: 1, kind: output, shape index: {}]  }
   0x1   :  { %7 = vsyncpa [#allocation4], 0  ;;  %s90_s6 = smov [#allocation2]   ;;  %s42_s10 = scalar_lea.hbm %s126_s0, 256 }
   0x2   :  { %s14_s7 = sshll.u32 %s90_s6, 4  ;;  %p43_p0 = scmp.ne.s32.totalorder %s126_s0, %s42_s10  ;;  %s15_s7 = int_to_ptr.vmem [resolvable:$true] %s14_s7 }
   0x3   :  { %p46_p1 = scmp.lt.u32.totalorder %s42_s10, %s126_s0 }
   0x5   :  { %p48_p2 = pnand %p46_p1, %p43_p0 }
   0x7   :  { %51 = shalt.err (!%p48_p2)
}
   0x8   :  { %s52_s15 = scalar_lea.vmem %s15_s7, 256  ;;  %p57_p4 = scmp.lt.s32.totalorder %s15_s7, %s15_s7 }
   0x9   :  { %p53_p3 = scmp.ne.s32.totalorder %s15_s7, %s52_s15  ;;  %p58_p5 = scmp.lt.s32.totalorder %s52_s15, %s52_s15 }
   0xb   :  { %p59_p6 = por %p58_p5, %p57_p4 }
   0xd   :  { %p60_p7 = pnand %p59_p6, %p53_p3 }
   0xf   :  { %63 = shalt.err (!%p60_p7)
}
  0x10   :  { %17 = dma.hbm_to_vmem [thread:$0]  %s126_s0, 256, %s15_s7, [#allocation3]  }
  0x11   :  { %86 = dma.done.wait [#allocation3], 256  }
  0x12   :  { %87 = vsyncadd [#allocation3], 4294967040  ;;  %s91_s18 = smov [#allocation5]   ;;  %v21_v0 = vld [vmem:[#allocation2] sm:$0xff]  ;;  %v22_v1 = vld [vmem:[#allocation2 + $0x8] sm:$0xff] }
  0x13   :  { %s31_s19 = sshll.u32 %s91_s18, 4  ;;  %23 = vst [vmem:[#allocation5] sm:$0xff] %v21_v0  ;;  %24 = vst [vmem:[#allocation5 + $0x8] sm:$0xff] %v22_v1  ;;  %s32_s19 = int_to_ptr.vmem [resolvable:$true] %s31_s19 }
  0x14   :  { %s64_s20 = scalar_lea.vmem %s32_s19, 256  ;;  %p69_p9 = scmp.lt.s32.totalorder %s32_s19, %s32_s19 }
  0x15   :  { %p65_p8 = scmp.ne.s32.totalorder %s32_s19, %s64_s20  ;;  %p70_p10 = scmp.lt.s32.totalorder %s64_s20, %s64_s20 }
  0x17   :  { %p71_p11 = por %p70_p10, %p69_p9 }
  0x19   :  { %p72_p12 = pnand %p71_p11, %p65_p8 }
  0x1b   :  { %75 = shalt.err (!%p72_p12)
}
  0x1c   :  { %s76_s0 = scalar_lea.hbm %s127_s1, 256 }
  0x1d   :  { %p77_p13 = scmp.ne.s32.totalorder %s127_s1, %s76_s0  ;;  %p80_p0 = scmp.lt.u32.totalorder %s76_s0, %s127_s1 }
  0x1f   :  { %p82_p1 = pnand %p80_p0, %p77_p13 }
  0x21   :  { %85 = shalt.err (!%p82_p1)
}
  0x22   :  { %34 = dma.vmem_to_hbm [thread:$0]  %s32_s19, 256, %s127_s1, [#allocation4]  }
  0x23   :  { %88 = dma.done.wait [#allocation4], 256  }
  0x24   :  { %89 = vsyncadd [#allocation4], 4294967040 }
  0x25   :  { %38 = vsyncpa [#allocation3], 1 }
  0x26   :  { %39 = vsyncpa [#allocation4], 1 }

</bundles_post_ra>
